<compile_context>
chip_gen: v7x
topology: tpu7x:2x2x1
jax: 0.10.0
libtpu: 0.0.40
codegen_flags: <defaults>
</compile_context>

<pallas_src>
import functools

import jax
import jax.numpy as jnp
from jax import lax
from jax.experimental import pallas as pl
from jax.experimental.pallas import tpu as pltpu

_LANE = 128
_VMEM_LIMIT = 32 * 1024 * 1024  # explicit scoped-VMEM budget; safe on v5e/v6e/v7x


def _pick_tile(dim, cap, base=_LANE):
    """Largest multiple of `base` that divides `dim` and is <= cap.

    Falls back to the full dimension (a full-extent block is always legal)."""
    best = None
    t = base
    while t <= min(cap, dim):
        if dim % t == 0:
            best = t
        t += base
    return best if best is not None else dim


# ----------------------------------------------------------------------------
# Eval-path kernel:  O = A @ X   (A: (M, K) bf16, X: (K, D) bf16, O: (M, D) f32)
# Grid = (M // tm, K // tk); tn == D (j axis dropped); f32 VMEM accumulator.
# ----------------------------------------------------------------------------
def _spmm_kernel(a_ref, x_ref, o_ref, acc_ref):
    @pl.when(pl.program_id(1) == 0)
    def _init():
        acc_ref[...] = jnp.zeros_like(acc_ref)

    acc_ref[...] += jnp.dot(a_ref[...], x_ref[...],
                            preferred_element_type=jnp.float32)

    @pl.when(pl.program_id(1) == pl.num_programs(1) - 1)
    def _store():
        o_ref[...] = acc_ref[...].astype(o_ref.dtype)


@functools.partial(jax.jit, static_argnames=("tm", "tk"))
def spmm_pallas(a, x, *, tm=1024, tk=512):
    """Dense (M,K) @ (K,D) on the MXU; inputs streamed as bf16, f32 accumulate."""
    M, K = a.shape
    K2, D = x.shape
    assert K == K2
    tm_, tk_ = _pick_tile(M, tm), _pick_tile(K, tk)

    a = a.astype(jnp.bfloat16)
    x = x.astype(jnp.bfloat16)

    return pl.pallas_call(
        _spmm_kernel,
        out_shape=jax.ShapeDtypeStruct((M, D), jnp.float32),
        grid_spec=pltpu.PrefetchScalarGridSpec(
            num_scalar_prefetch=0,
            grid=(M // tm_, K // tk_),
            in_specs=[
                pl.BlockSpec((tm_, tk_), lambda i, k: (i, k)),
                pl.BlockSpec((tk_, D), lambda i, k: (k, 0)),
            ],
            out_specs=pl.BlockSpec((tm_, D), lambda i, k: (i, 0)),
            scratch_shapes=[pltpu.VMEM((tm_, D), jnp.float32)],
        ),
        compiler_params=pltpu.CompilerParams(
            dimension_semantics=("parallel", "arbitrary"),
            vmem_limit_bytes=_VMEM_LIMIT,
        ),
    )(a, x)


# ----------------------------------------------------------------------------
# Training-path kernel: same matmul with edge dropout fused on the A tiles and
# mess dropout fused into the store epilogue (no dense dropped A in HBM).
# ----------------------------------------------------------------------------
def _uniform_from_bits(shape):
    """U[0, 1) from the on-chip PRNG (top 23 bits -> exact f32 conversion)."""
    bits = pltpu.bitcast(pltpu.prng_random_bits(shape), jnp.uint32)
    bits = lax.shift_right_logical(bits, jnp.uint32(9))
    return pltpu.bitcast(bits, jnp.int32).astype(jnp.float32) * (1.0 / (1 << 23))


def _spmm_dropout_kernel(seed_ref, a_ref, x_ref, o_ref, acc_ref, *,
                         edge_rate, mess_rate, apply_edge, apply_mess):
    i = pl.program_id(0)
    k = pl.program_id(1)
    nk = pl.num_programs(1)

    @pl.when(k == 0)
    def _init():
        acc_ref[...] = jnp.zeros_like(acc_ref)

    a = a_ref[...]
    if apply_edge:
        # Reference `_sparse_dropout`: keep an entry iff floor(rate + U) == 1,
        # i.e. keep-probability == rate, survivors scaled by 1/(1 - rate).
        # (Unusual vs. the standard 1-rate convention, but it is exactly what
        # the spec module computes, so it is reproduced verbatim; the scale is
        # applied once to the accumulator in the epilogue.)
        pltpu.prng_seed(seed_ref[0] + i * (nk + 1) + k)
        u = _uniform_from_bits(a.shape)
        a = jnp.where(u >= (1.0 - edge_rate), a, jnp.zeros_like(a))

    acc_ref[...] += jnp.dot(a, x_ref[...], preferred_element_type=jnp.float32)

    @pl.when(k == nk - 1)
    def _store():
        res = acc_ref[...]
        if apply_edge:
            res = res * (1.0 / (1.0 - edge_rate))
        if apply_mess:
            # nn.Dropout(p): zero with prob p, scale survivors by 1/(1-p).
            pltpu.prng_seed(seed_ref[0] + i * (nk + 1) + nk)
            u = _uniform_from_bits(res.shape)
            res = jnp.where(u < (1.0 - mess_rate),
                            res * (1.0 / (1.0 - mess_rate)),
                            jnp.zeros_like(res))
        o_ref[...] = res.astype(o_ref.dtype)


@functools.partial(
    jax.jit,
    static_argnames=("edge_rate", "mess_rate", "apply_edge", "apply_mess",
                     "tm", "tk"),
)
def spmm_dropout_pallas(seed, a, x, *, edge_rate, mess_rate, apply_edge,
                        apply_mess, tm=1024, tk=512):
    M, K = a.shape
    K2, D = x.shape
    assert K == K2
    tm_, tk_ = _pick_tile(M, tm), _pick_tile(K, tk)

    a = a.astype(jnp.bfloat16)
    x = x.astype(jnp.bfloat16)

    kernel = functools.partial(
        _spmm_dropout_kernel,
        edge_rate=float(edge_rate), mess_rate=float(mess_rate),
        apply_edge=bool(apply_edge), apply_mess=bool(apply_mess))

    return pl.pallas_call(
        kernel,
        out_shape=jax.ShapeDtypeStruct((M, D), jnp.float32),
        grid_spec=pltpu.PrefetchScalarGridSpec(
            num_scalar_prefetch=1,   # per-hop PRNG seed lives in SMEM
            grid=(M // tm_, K // tk_),
            in_specs=[
                pl.BlockSpec((tm_, tk_), lambda i, k, seed_ref: (i, k)),
                pl.BlockSpec((tk_, D), lambda i, k, seed_ref: (k, 0)),
            ],
            out_specs=pl.BlockSpec((tm_, D), lambda i, k, seed_ref: (i, 0)),
            scratch_shapes=[pltpu.VMEM((tm_, D), jnp.float32)],
        ),
        compiler_params=pltpu.CompilerParams(
            dimension_semantics=("parallel", "arbitrary"),
            vmem_limit_bytes=_VMEM_LIMIT,
        ),
    )(seed, a, x)


# ----------------------------------------------------------------------------
# GraphConv forward (glue in plain JAX, matmuls + dropout in Pallas)
# ----------------------------------------------------------------------------
def graph_conv_forward(
    user_embed,
    item_embed,
    interact_mat,            # densified (N, N) adjacency
    *,
    n_hops,
    n_users,
    edge_dropout_rate=0.2,
    mess_dropout_rate=0.1,
    mess_dropout=True,
    edge_dropout=True,
    seed=0,
):
    all_embed = jnp.concatenate([user_embed, item_embed], axis=0)   # (N, D)
    N, _ = all_embed.shape

    # Cast the adjacency ONCE, outside the hop loop (bf16 halves the dominant
    # HBM stream; the kernel keeps an f32 accumulator).
    a = interact_mat.astype(jnp.bfloat16)

    # Pad N up to a multiple of 128 if needed (zero rows/cols are exact no-ops).
    n_pad = (-N) % _LANE
    agg_embed = all_embed
    if n_pad:
        a = jnp.pad(a, ((0, n_pad), (0, n_pad)))
        agg_embed = jnp.pad(agg_embed, ((0, n_pad), (0, 0)))

    embs = [agg_embed]
    for hop in range(n_hops):
        if edge_dropout or mess_dropout:
            hop_seed = jnp.array([seed + hop * 1_000_003], dtype=jnp.int32)
            agg_embed = spmm_dropout_pallas(
                hop_seed, a, agg_embed,
                edge_rate=edge_dropout_rate,
                mess_rate=mess_dropout_rate,
                apply_edge=edge_dropout,
                apply_mess=mess_dropout,
            )
        else:
            agg_embed = spmm_pallas(a, agg_embed)                   # hot path
        embs.append(agg_embed)

    embs = jnp.stack(embs, axis=1)[:N]      # (N, n_hops+1, D)
    return embs[:n_users], embs[n_users:]


# ----------------------------------------------------------------------------
# Demo
# ----------------------------------------------------------------------------
if __name__ == "__main__":
    n_users, n_items, dim, n_hops = 256, 256, 128, 3
    N = n_users + n_items

    key = jax.random.PRNGKey(0)
    k_u, k_i, k_adj = jax.random.split(key, 3)

    user_embed = jax.random.normal(k_u, (n_users, dim), dtype=jnp.float32)
    item_embed = jax.random.normal(k_i, (n_items, dim), dtype=jnp.float32)

    # Deterministic synthetic bipartite interaction matrix (~5% density),
    # symmetrically normalized (what interact_mat typically holds).
    ui = (jax.random.uniform(k_adj, (n_users, n_items)) < 0.05).astype(jnp.float32)
    adj = jnp.zeros((N, N), dtype=jnp.float32)
    adj = adj.at[:n_users, n_users:].set(ui)
    adj = adj.at[n_users:, :n_users].set(ui.T)
    deg = jnp.maximum(adj.sum(axis=1), 1.0)       # fixed: jnp.clip a_min kwarg removed
    d_inv_sqrt = 1.0 / jnp.sqrt(deg)
    interact_mat = adj * d_inv_sqrt[:, None] * d_inv_sqrt[None, :]

    # Deterministic eval path (no dropout), mirroring the reference matmul chain.
    users_out, items_out = graph_conv_forward(
        user_embed,
        item_embed,
        interact_mat,
        n_hops=n_hops,
        n_users=n_users,
        mess_dropout=False,
        edge_dropout=False,
    )
    jax.block_until_ready((users_out, items_out))

    # Pure-JAX reference with the same numerics (bf16 inputs, f32 accumulate).
    all_e = jnp.concatenate([user_embed, item_embed], axis=0)
    a_bf = interact_mat.astype(jnp.bfloat16)
    ref = [all_e]
    agg = all_e
    for _ in range(n_hops):
        agg = jnp.dot(a_bf, agg.astype(jnp.bfloat16),
                      preferred_element_type=jnp.float32)
        ref.append(agg)
    ref = jnp.stack(ref, axis=1)

    assert users_out.shape == (n_users, n_hops + 1, dim)
    assert items_out.shape == (n_items, n_hops + 1, dim)
    assert jnp.allclose(users_out, ref[:n_users], atol=1e-2, rtol=1e-2)
    assert jnp.allclose(items_out, ref[n_users:], atol=1e-2, rtol=1e-2)

    # Extra check with forced-small tiles so the multi-step k-reduction /
    # accumulator path of the kernel is exercised too (grid = (4, 4)).
    y_tiled = spmm_pallas(interact_mat, all_e, tm=128, tk=128)
    y_ref = jnp.dot(a_bf, all_e.astype(jnp.bfloat16),
                    preferred_element_type=jnp.float32)
    jax.block_until_ready(y_tiled)
    assert jnp.allclose(y_tiled, y_ref, atol=1e-2, rtol=1e-2)

    print("KERNEL_OK")
</pallas_src>

<mosaic_0001>
module attributes {stable_mosaic.version = 11 : i64} {
  func.func @_spmm_kernel(%arg0: i32, %arg1: i32, %arg2: memref<512x512xbf16, #tpu.memory_space<vmem>>, %arg3: memref<512x128xbf16, #tpu.memory_space<vmem>>, %arg4: memref<512x128xf32, #tpu.memory_space<vmem>>, %arg5: memref<512x128xf32, #tpu.memory_space<vmem>>) attributes {dimension_semantics = [#tpu.dimension_semantics<parallel>, #tpu.dimension_semantics<arbitrary>], iteration_bounds = array<i64: 1, 1>, scalar_prefetch = 0 : i64, scratch_operands = 1 : i64, tpu.core_type = #tpu.core_type<tc>, window_params = [{transform_indices = @transform_0, window_bounds = array<i64: 512, 512>}, {transform_indices = @transform_1, window_bounds = array<i64: 512, 128>}, {transform_indices = @transform_2, window_bounds = array<i64: 512, 128>}]} {
    %c0_i32 = arith.constant 0 : i32
    %0 = arith.cmpi eq, %arg1, %c0_i32 : i32
    %1 = arith.extui %0 : i1 to i32
    %c0_i32_0 = arith.constant 0 : i32
    %2 = arith.cmpi ne, %1, %c0_i32_0 : i32
    scf.if %2 {
      %cst_10 = arith.constant 0.000000e+00 : f32
      %12 = vector.broadcast %cst_10 : f32 to vector<512x128xf32>
      %c0_11 = arith.constant 0 : index
      %c0_12 = arith.constant 0 : index
      %13 = vector.load %arg5[%c0_11, %c0_12] : memref<512x128xf32, #tpu.memory_space<vmem>>, vector<512x128xf32>
      tpu.vector_store %arg5[%c0_11, %c0_12], %12 {strides = array<i32>} : memref<512x128xf32, #tpu.memory_space<vmem>>, vector<512x128xf32>,
    } else {
    }
    %c0 = arith.constant 0 : index
    %c0_1 = arith.constant 0 : index
    %3 = vector.load %arg5[%c0, %c0_1] : memref<512x128xf32, #tpu.memory_space<vmem>>, vector<512x128xf32>
    %c0_2 = arith.constant 0 : index
    %c0_3 = arith.constant 0 : index
    %4 = vector.load %arg2[%c0_2, %c0_3] : memref<512x512xbf16, #tpu.memory_space<vmem>>, vector<512x512xbf16>
    %c0_4 = arith.constant 0 : index
    %c0_5 = arith.constant 0 : index
    %5 = vector.load %arg3[%c0_4, %c0_5] : memref<512x128xbf16, #tpu.memory_space<vmem>>, vector<512x128xbf16>
    %cst = arith.constant dense<0.000000e+00> : vector<512x128xf32>
    %6 = tpu.matmul %4, %5, %cst {dimension_numbers = #tpu.dot_dimension_numbers<[1], [0], [0], [1], [0, 0, 1, 1], [], []>} : vector<512x512xbf16>, vector<512x128xbf16>, vector<512x128xf32> -> vector<512x128xf32>
    %7 = arith.addf %3, %6 : vector<512x128xf32>
    %c0_6 = arith.constant 0 : index
    %c0_7 = arith.constant 0 : index
    %8 = vector.load %arg5[%c0_6, %c0_7] : memref<512x128xf32, #tpu.memory_space<vmem>>, vector<512x128xf32>
    tpu.vector_store %arg5[%c0_6, %c0_7], %7 {strides = array<i32>} : memref<512x128xf32, #tpu.memory_space<vmem>>, vector<512x128xf32>,
    %c0_i32_8 = arith.constant 0 : i32
    %9 = arith.cmpi eq, %arg1, %c0_i32_8 : i32
    %10 = arith.extui %9 : i1 to i32
    %c0_i32_9 = arith.constant 0 : i32
    %11 = arith.cmpi ne, %10, %c0_i32_9 : i32
    scf.if %11 {
      %c0_10 = arith.constant 0 : index
      %c0_11 = arith.constant 0 : index
      %12 = vector.load %arg5[%c0_10, %c0_11] : memref<512x128xf32, #tpu.memory_space<vmem>>, vector<512x128xf32>
      %c0_12 = arith.constant 0 : index
      %c0_13 = arith.constant 0 : index
      %13 = vector.load %arg4[%c0_12, %c0_13] : memref<512x128xf32, #tpu.memory_space<vmem>>, vector<512x128xf32>
      tpu.vector_store %arg4[%c0_12, %c0_13], %12 {strides = array<i32>} : memref<512x128xf32, #tpu.memory_space<vmem>>, vector<512x128xf32>,
    } else {
    }
    return
  }
  func.func @transform_0(%arg0: i32, %arg1: i32) -> (i32, i32) {
    %c0_i32 = arith.constant 0 : i32
    return %arg0, %arg1 : i32, i32
  }
  func.func @transform_1(%arg0: i32, %arg1: i32) -> (i32, i32) {
    %c0_i32 = arith.constant 0 : i32
    %c0_i32_0 = arith.constant 0 : i32
    return %arg1, %c0_i32 : i32, i32
  }
  func.func @transform_2(%arg0: i32, %arg1: i32) -> (i32, i32) {
    %c0_i32 = arith.constant 0 : i32
    %c0_i32_0 = arith.constant 0 : i32
    return %arg0, %c0_i32 : i32, i32
  }
}

</mosaic_0001>

<bundles_post_ra>
// kernel: spmm_pallas.1
= control target key start
LH: loop header
LB: loop body
LE: loop exit
PB: predicated region body
PF: predicated region fallthrough
CT: control target
= control target key end

     0   :  { %7 = vsyncpa [#allocation4], 0  ;;  %s2714_s0 = inlined_call_operand.hbm [shape: bf16[512,512], index: 0, kind: input, shape index: {}]   ;;  %s2715_s1 = inlined_call_operand.vmem [shape: bf16[512,128], index: 1, kind: input, shape index: {}]   ;;  %s2716_s2 = inlined_call_operand.hbm [shape: f32[512,128], index: 2, kind: output, shape index: {}]  }
   0x1   :  { %8 = vsyncpa [#allocation5], 0  ;;  %s2540_s9 = smov [#allocation3]   ;;  %s2492_s13 = scalar_lea.hbm %s2714_s0, 16384 }
   0x2   :  { %s14_s10 = sshll.u32 %s2540_s9, 4  ;;  %p2493_p0 = scmp.ne.s32.totalorder %s2714_s0, %s2492_s13  ;;  %s15_s10 = int_to_ptr.vmem [resolvable:$true] %s14_s10 }
   0x3   :  { %p2496_p1 = scmp.lt.u32.totalorder %s2492_s13, %s2714_s0 }
   0x5   :  { %p2498_p2 = pnand %p2496_p1, %p2493_p0 }
   0x7   :  { %2501 = shalt.err (!%p2498_p2)
}
   0x8   :  { %s2502_s18 = scalar_lea.vmem %s15_s10, 16384  ;;  %p2507_p4 = scmp.lt.s32.totalorder %s15_s10, %s15_s10 }
   0x9   :  { %p2503_p3 = scmp.ne.s32.totalorder %s15_s10, %s2502_s18  ;;  %p2508_p5 = scmp.lt.s32.totalorder %s2502_s18, %s2502_s18 }
   0xb   :  { %p2509_p6 = por %p2508_p5, %p2507_p4 }
   0xd   :  { %p2510_p7 = pnand %p2509_p6, %p2503_p3 }
   0xf   :  { %2513 = shalt.err (!%p2510_p7)
}
  0x10   :  { %s2541_s19 = smov 256   ;;  %s2542_s20 = smov 16  }
  0x11   :  { %20 = dma.hbm_to_vmem [thread:$0]  %s2714_s0, 16384, %s15_s10, [#allocation4], %s2541_s19, %s2541_s19, %s2542_s20  }
  0x12   :  { %2536 = dma.done.wait [#allocation4], 16384  }
  0x13   :  { %2537 = vsyncadd [#allocation4], 4294950912  ;;  %v2543_v0 = vmov 0   ;;  %v2268_v1 = vld [vmem:[%s2715_s1] sm:$0xff]   ;;  %v2270_v3 = vld [vmem:[%s2715_s1 + $0x8] sm:$0xff]  }
  0x14   :  { %1183 = vmatprep.subr.bf16.mxu1 %v2543_v0  ;;  %1472 = vmatprep.subr.bf16.mxu0 %v2543_v0  ;;  %v2269_v2 = vld [vmem:[%s2715_s1 + $0x80] sm:$0xff]   ;;  %v2271_v4 = vld [vmem:[%s2715_s1 + $0x88] sm:$0xff]   ;;  %v2272_v5 = vld [vmem:[%s2715_s1 + $0x10] sm:$0xff]  }
  0x15   :  { %1184 = vmatpush1.bf16.msra.mxu1 %v2268_v1  ;;  %1473 = vmatpush1.bf16.msra.mxu0 %v2269_v2  ;;  %v2273_v6 = vld [vmem:[%s2715_s1 + $0x90] sm:$0xff]   ;;  %v2274_v7 = vld [vmem:[%s2715_s1 + $0x18] sm:$0xff]   ;;  %v2276_v9 = vld [vmem:[%s2715_s1 + $0x20] sm:$0xff]  }
  0x16   :  { %1185 = vmatprep.subr.bf16.mxu1 %v2543_v0  ;;  %1474 = vmatprep.subr.bf16.mxu0 %v2543_v0  ;;  %v2275_v8 = vld [vmem:[%s2715_s1 + $0x98] sm:$0xff]   ;;  %v2277_v10 = vld [vmem:[%s2715_s1 + $0xa0] sm:$0xff]   ;;  %v2278_v11 = vld [vmem:[%s2715_s1 + $0x28] sm:$0xff]  }
  0x17   :  { %v2279_v12 = vld [vmem:[%s2715_s1 + $0xa8] sm:$0xff]   ;;  %v2280_v13 = vld [vmem:[%s2715_s1 + $0x30] sm:$0xff]   ;;  %v2282_v15 = vld [vmem:[%s2715_s1 + $0x38] sm:$0xff]  }
  0x18   :  { %v2281_v14 = vld [vmem:[%s2715_s1 + $0xb0] sm:$0xff]   ;;  %v2283_v16 = vld [vmem:[%s2715_s1 + $0xb8] sm:$0xff]   ;;  %v2284_v17 = vld [vmem:[%s2715_s1 + $0x40] sm:$0xff]  }
  0x19   :  { %1186 = vmatpush1.bf16.msra.mxu1 %v2270_v3  ;;  %1475 = vmatpush1.bf16.msra.mxu0 %v2271_v4  ;;  %v2285_v18 = vld [vmem:[%s2715_s1 + $0xc0] sm:$0xff]   ;;  %v2286_v20 = vld [vmem:[%s2715_s1 + $0x48] sm:$0xff]   ;;  %v2288_v23 = vld [vmem:[%s2715_s1 + $0x50] sm:$0xff]  }
  0x1a   :  { %1187 = vmatprep.subr.bf16.mxu1 %v2543_v0  ;;  %1476 = vmatprep.subr.bf16.mxu0 %v2543_v0  ;;  %v2302_v19 = vld [vmem:[#allocation3 + $0x4] ss:$16 sps:$4 sm:$0xff]   ;;  %v2305_v21 = vld [vmem:[#allocation3 + $0xc] ss:$16 sps:$4 sm:$0xff]   ;;  %v2300_v35 = vld [vmem:[#allocation3] ss:$16 sps:$4 sm:$0xff]  }
  0x1b   :  { %v2287_v22 = vld [vmem:[%s2715_s1 + $0xc8] sm:$0xff]   ;;  %1215 = vmatprep.mubr.bf16.mxu1 %v2302_v19  ;;  %1504 = vmatprep.mubr.bf16.mxu0 %v2305_v21  ;;  %v2289_v24 = vld [vmem:[%s2715_s1 + $0xd0] sm:$0xff]   ;;  %v2290_v25 = vld [vmem:[%s2715_s1 + $0x58] sm:$0xff]  }
  0x1c   :  { %v2291_v26 = vld [vmem:[%s2715_s1 + $0xd8] sm:$0xff]   ;;  %v2292_v27 = vld [vmem:[%s2715_s1 + $0x60] sm:$0xff]   ;;  %v2294_v29 = vld [vmem:[%s2715_s1 + $0x68] sm:$0xff]  }
  0x1d   :  { %1188 = vmatpush1.bf16.msra.mxu1 %v2272_v5  ;;  %1477 = vmatpush1.bf16.msra.mxu0 %v2273_v6  ;;  %v2293_v28 = vld [vmem:[%s2715_s1 + $0xe0] sm:$0xff]   ;;  %v2295_v30 = vld [vmem:[%s2715_s1 + $0xe8] sm:$0xff]   ;;  %v2296_v31 = vld [vmem:[%s2715_s1 + $0x70] sm:$0xff]  }
  0x1e   :  { %1189 = vmatprep.subr.bf16.mxu1 %v2543_v0  ;;  %1478 = vmatprep.subr.bf16.mxu0 %v2543_v0  ;;  %v2297_v32 = vld [vmem:[%s2715_s1 + $0xf0] sm:$0xff]   ;;  %v2298_v33 = vld [vmem:[%s2715_s1 + $0x78] sm:$0xff]  }
  0x1f   :  { %v2299_v34 = vld [vmem:[%s2715_s1 + $0xf8] sm:$0xff]   ;;  %v2306_v37 = vld [vmem:[#allocation3 + $0x24] ss:$16 sps:$4 sm:$0xff]   ;;  %v2310_v39 = vld [vmem:[#allocation3 + $0x20] ss:$16 sps:$4 sm:$0xff]   ;;  %s2544_s1 = smov [#allocation6]  }
  0x20   :  { %v2303_v36 = vld [vmem:[#allocation3 + $0x8] ss:$16 sps:$4 sm:$0xff]   ;;  %v2308_v38 = vld [vmem:[#allocation3 + $0x2c] ss:$16 sps:$4 sm:$0xff]   ;;  %v2312_v41 = vld [vmem:[#allocation3 + $0x44] ss:$16 sps:$4 sm:$0xff]  }
  0x21   :  { %1190 = vmatpush1.bf16.msra.mxu1 %v2274_v7  ;;  %1479 = vmatpush1.bf16.msra.mxu0 %v2275_v8  ;;  %v2311_v40 = vld [vmem:[#allocation3 + $0x28] ss:$16 sps:$4 sm:$0xff]   ;;  %v2314_v42 = vld [vmem:[#allocation3 + $0x4c] ss:$16 sps:$4 sm:$0xff]   ;;  %v2316_v43 = vld [vmem:[#allocation3 + $0x40] ss:$16 sps:$4 sm:$0xff]  }
  0x22   :  { %1191 = vmatprep.subr.bf16.mxu1 %v2543_v0  ;;  %1480 = vmatprep.subr.bf16.mxu0 %v2543_v0  ;;  %v2317_v44 = vld [vmem:[#allocation3 + $0x48] ss:$16 sps:$4 sm:$0xff]   ;;  %v2318_v45 = vld [vmem:[#allocation3 + $0x64] ss:$16 sps:$4 sm:$0xff]   ;;  %v2320_v46 = vld [vmem:[#allocation3 + $0x6c] ss:$16 sps:$4 sm:$0xff]  }
  0x23   :  { %v2322_v47 = vld [vmem:[#allocation3 + $0x60] ss:$16 sps:$4 sm:$0xff]   ;;  %v2323_v48 = vld [vmem:[#allocation3 + $0x68] ss:$16 sps:$4 sm:$0xff]   ;;  %v2324_v49 = vld [vmem:[#allocation3 + $0x84] ss:$16 sps:$4 sm:$0xff]  }
  0x24   :  { %v2326_v50 = vld [vmem:[#allocation3 + $0x8c] ss:$16 sps:$4 sm:$0xff]   ;;  %v2328_v51 = vld [vmem:[#allocation3 + $0x80] ss:$16 sps:$4 sm:$0xff]   ;;  %v2329_v52 = vld [vmem:[#allocation3 + $0x88] ss:$16 sps:$4 sm:$0xff]  }
  0x25   :  { %1192 = vmatpush1.bf16.msra.mxu1 %v2276_v9  ;;  %1481 = vmatpush1.bf16.msra.mxu0 %v2277_v10  ;;  %v2330_v53 = vld [vmem:[#allocation3 + $0xa4] ss:$16 sps:$4 sm:$0xff]   ;;  %v2332_v54 = vld [vmem:[#allocation3 + $0xac] ss:$16 sps:$4 sm:$0xff]   ;;  %v2334_v55 = vld [vmem:[#allocation3 + $0xa0] ss:$16 sps:$4 sm:$0xff]  }
  0x26   :  { %1193 = vmatprep.subr.bf16.mxu1 %v2543_v0  ;;  %1482 = vmatprep.subr.bf16.mxu0 %v2543_v0  ;;  %v2335_v56 = vld [vmem:[#allocation3 + $0xa8] ss:$16 sps:$4 sm:$0xff]   ;;  %v2336_v57 = vld [vmem:[#allocation3 + $0xc4] ss:$16 sps:$4 sm:$0xff]   ;;  %v2338_v58 = vld [vmem:[#allocation3 + $0xcc] ss:$16 sps:$4 sm:$0xff]  }
  0x27   :  { %v2340_v59 = vld [vmem:[#allocation3 + $0xc0] ss:$16 sps:$4 sm:$0xff]   ;;  %v2341_v60 = vld [vmem:[#allocation3 + $0xc8] ss:$16 sps:$4 sm:$0xff]   ;;  %v2342_v61 = vld [vmem:[#allocation3 + $0xe4] ss:$16 sps:$4 sm:$0xff]  }
  0x28   :  { %v2344_v62 = vld [vmem:[#allocation3 + $0xec] ss:$16 sps:$4 sm:$0xff]   ;;  %v2346_v63 = vld [vmem:[#allocation3 + $0xe0] ss:$16 sps:$4 sm:$0xff]   ;;  %v2348_v1 = vld [vmem:[#allocation3 + $0x104] ss:$16 sps:$4 sm:$0xff]  }
  0x29   :  { %1194 = vmatpush1.bf16.msra.mxu1 %v2278_v11  ;;  %1483 = vmatpush1.bf16.msra.mxu0 %v2279_v12  ;;  %v2350_v2 = vld [vmem:[#allocation3 + $0x10c] ss:$16 sps:$4 sm:$0xff]   ;;  %v2352_v3 = vld [vmem:[#allocation3 + $0x100] ss:$16 sps:$4 sm:$0xff]   ;;  %v2353_v4 = vld [vmem:[#allocation3 + $0x108] ss:$16 sps:$4 sm:$0xff]  }
  0x2a   :  { %1195 = vmatprep.subr.bf16.mxu1 %v2543_v0  ;;  %1484 = vmatprep.subr.bf16.mxu0 %v2543_v0  ;;  %v2354_v5 = vld [vmem:[#allocation3 + $0x124] ss:$16 sps:$4 sm:$0xff]   ;;  %v2356_v6 = vld [vmem:[#allocation3 + $0x12c] ss:$16 sps:$4 sm:$0xff]   ;;  %v2358_v7 = vld [vmem:[#allocation3 + $0x120] ss:$16 sps:$4 sm:$0xff]  }
  0x2b   :  { %v2359_v8 = vld [vmem:[#allocation3 + $0x128] ss:$16 sps:$4 sm:$0xff]   ;;  %v2360_v9 = vld [vmem:[#allocation3 + $0x144] ss:$16 sps:$4 sm:$0xff]   ;;  %v2362_v10 = vld [vmem:[#allocation3 + $0x14c] ss:$16 sps:$4 sm:$0xff]  }
  0x2c   :  { %v2364_v11 = vld [vmem:[#allocation3 + $0x140] ss:$16 sps:$4 sm:$0xff]   ;;  %v2365_v12 = vld [vmem:[#allocation3 + $0x148] ss:$16 sps:$4 sm:$0xff]   ;;  %v2378_v21 = vld [vmem:[#allocation3 + $0x1a4] ss:$16 sps:$4 sm:$0xff]  }
  0x2d   :  { %1196 = vmatpush1.bf16.msra.mxu1 %v2280_v13  ;;  %1485 = vmatpush1.bf16.msra.mxu0 %v2281_v14  ;;  %v2366_v13 = vld [vmem:[#allocation3 + $0x164] ss:$16 sps:$4 sm:$0xff]   ;;  %v2368_v14 = vld [vmem:[#allocation3 + $0x16c] ss:$16 sps:$4 sm:$0xff]   ;;  %v2376_v19 = vld [vmem:[#allocation3 + $0x180] ss:$16 sps:$4 sm:$0xff]  }
  0x2e   :  { %1197 = vmatprep.subr.bf16.mxu1 %v2543_v0  ;;  %1486 = vmatprep.subr.bf16.mxu0 %v2543_v0  ;;  %s2025_s0 = sshll.u32 %s2544_s1, 4  ;;  %s2026_s0 = int_to_ptr.vmem [resolvable:$true] %s2025_s0 }
  0x2f   :  { %s2514_s29 = scalar_lea.vmem %s2026_s0, 8192  ;;  %p2519_p9 = scmp.lt.s32.totalorder %s2026_s0, %s2026_s0 }
  0x30   :  { %p2515_p8 = scmp.ne.s32.totalorder %s2026_s0, %s2514_s29  ;;  %p2520_p10 = scmp.lt.s32.totalorder %s2514_s29, %s2514_s29 }
  0x31   :  { %1198 = vmatpush1.bf16.msra.mxu1 %v2282_v15  ;;  %1487 = vmatpush1.bf16.msra.mxu0 %v2283_v16  ;;  %v2370_v15 = vld [vmem:[#allocation3 + $0x160] ss:$16 sps:$4 sm:$0xff]   ;;  %v2371_v16 = vld [vmem:[#allocation3 + $0x168] ss:$16 sps:$4 sm:$0xff]  }
  0x32   :  { %1199 = vmatprep.subr.bf16.mxu1 %v2543_v0  ;;  %1488 = vmatprep.subr.bf16.mxu0 %v2543_v0  ;;  %p2521_p11 = por %p2520_p10, %p2519_p9 }
  0x34   :  { %p2522_p12 = pnand %p2521_p11, %p2515_p8 }
  0x35   :  { %1200 = vmatpush1.bf16.msra.mxu1 %v2284_v17  ;;  %1489 = vmatpush1.bf16.msra.mxu0 %v2285_v18  ;;  %v2372_v17 = vld [vmem:[#allocation3 + $0x184] ss:$16 sps:$4 sm:$0xff]   ;;  %v2374_v18 = vld [vmem:[#allocation3 + $0x18c] ss:$16 sps:$4 sm:$0xff]  }
  0x36   :  { %1201 = vmatprep.subr.bf16.mxu1 %v2543_v0  ;;  %1490 = vmatprep.subr.bf16.mxu0 %v2543_v0 }
  0x39   :  { %1202 = vmatpush1.bf16.msra.mxu1 %v2286_v20  ;;  %1491 = vmatpush1.bf16.msra.mxu0 %v2287_v22  ;;  %v2377_v20 = vld [vmem:[#allocation3 + $0x188] ss:$16 sps:$4 sm:$0xff]   ;;  %v2380_v22 = vld [vmem:[#allocation3 + $0x1ac] ss:$16 sps:$4 sm:$0xff]  }
  0x3a   :  { %1203 = vmatprep.subr.bf16.mxu1 %v2543_v0  ;;  %1492 = vmatprep.subr.bf16.mxu0 %v2543_v0 }
  0x3d   :  { %1204 = vmatpush1.bf16.msra.mxu1 %v2288_v23  ;;  %1493 = vmatpush1.bf16.msra.mxu0 %v2289_v24  ;;  %v2382_v23 = vld [vmem:[#allocation3 + $0x1a0] ss:$16 sps:$4 sm:$0xff]   ;;  %v2383_v24 = vld [vmem:[#allocation3 + $0x1a8] ss:$16 sps:$4 sm:$0xff]  }
  0x3e   :  { %1205 = vmatprep.subr.bf16.mxu1 %v2543_v0  ;;  %1494 = vmatprep.subr.bf16.mxu0 %v2543_v0 }
  0x41   :  { %1206 = vmatpush1.bf16.msra.mxu1 %v2290_v25  ;;  %1495 = vmatpush1.bf16.msra.mxu0 %v2291_v26  ;;  %v2384_v25 = vld [vmem:[#allocation3 + $0x1c4] ss:$16 sps:$4 sm:$0xff]   ;;  %v2386_v26 = vld [vmem:[#allocation3 + $0x1cc] ss:$16 sps:$4 sm:$0xff]  }
  0x42   :  { %1207 = vmatprep.subr.bf16.mxu1 %v2543_v0  ;;  %1496 = vmatprep.subr.bf16.mxu0 %v2543_v0 }
  0x45   :  { %1208 = vmatpush1.bf16.msra.mxu1 %v2292_v27  ;;  %1497 = vmatpush1.bf16.msra.mxu0 %v2293_v28  ;;  %v2388_v27 = vld [vmem:[#allocation3 + $0x1c0] ss:$16 sps:$4 sm:$0xff]   ;;  %v2389_v28 = vld [vmem:[#allocation3 + $0x1c8] ss:$16 sps:$4 sm:$0xff]  }
  0x46   :  { %1209 = vmatprep.subr.bf16.mxu1 %v2543_v0  ;;  %1498 = vmatprep.subr.bf16.mxu0 %v2543_v0 }
  0x49   :  { %1210 = vmatpush1.bf16.msra.mxu1 %v2294_v29  ;;  %1499 = vmatpush1.bf16.msra.mxu0 %v2295_v30  ;;  %v2390_v29 = vld [vmem:[#allocation3 + $0x1e4] ss:$16 sps:$4 sm:$0xff]   ;;  %v2392_v30 = vld [vmem:[#allocation3 + $0x1ec] ss:$16 sps:$4 sm:$0xff]  }
  0x4a   :  { %1211 = vmatprep.subr.bf16.mxu1 %v2543_v0  ;;  %1500 = vmatprep.subr.bf16.mxu0 %v2543_v0 }
  0x4d   :  { %1212 = vmatpush1.bf16.msra.mxu1 %v2296_v31  ;;  %1501 = vmatpush1.bf16.msra.mxu0 %v2297_v32  ;;  %v2394_v31 = vld [vmem:[#allocation3 + $0x1e0] ss:$16 sps:$4 sm:$0xff]   ;;  %v2395_v32 = vld [vmem:[#allocation3 + $0x1e8] ss:$16 sps:$4 sm:$0xff]  }
  0x4e   :  { %1213 = vmatprep.subr.bf16.mxu1 %v2543_v0  ;;  %1502 = vmatprep.subr.bf16.mxu0 %v2543_v0  ;;  %v2347_v0 = vld [vmem:[#allocation3 + $0xe8] ss:$16 sps:$4 sm:$0xff]  }
  0x51   :  { %1214 = vmatpush1.bf16.msra.mxu1 %v2298_v33  ;;  %1503 = vmatpush1.bf16.msra.mxu0 %v2299_v34  ;;  %v2396_v33 = vld [vmem:[#allocation3 + $0x204] ss:$16 sps:$4 sm:$0xff]   ;;  %v2398_v34 = vld [vmem:[#allocation3 + $0x20c] ss:$16 sps:$4 sm:$0xff]  }
  0x54   :  { %1216 = vmatmul.mubr.bf16.vlgmr.msra.gmra.mrb[0].mxu1 %v2300_v35  ;;  %1505 = vmatmul.mubr.bf16.vlgmr.msra.gmra.mrb[0].mxu0 %v2303_v36  ;;  %v2400_v35 = vld [vmem:[#allocation3 + $0x200] ss:$16 sps:$4 sm:$0xff]   ;;  %v2401_v36 = vld [vmem:[#allocation3 + $0x208] ss:$16 sps:$4 sm:$0xff]  }
  0x55   :  { %1223 = vmatprep.mubr.bf16.mxu1 %v2306_v37  ;;  %1512 = vmatprep.mubr.bf16.mxu0 %v2308_v38  ;;  %v2402_v37 = vld [vmem:[#allocation3 + $0x224] ss:$16 sps:$4 sm:$0xff]   ;;  %v2404_v38 = vld [vmem:[#allocation3 + $0x22c] ss:$16 sps:$4 sm:$0xff]  }
  0x5c   :  { %1224 = vmatmul.mubr.bf16.gmra.mrb[4].mxu1 %v2310_v39  ;;  %1513 = vmatmul.mubr.bf16.gmra.mrb[4].mxu0 %v2311_v40  ;;  %v2406_v39 = vld [vmem:[#allocation3 + $0x220] ss:$16 sps:$4 sm:$0xff]   ;;  %v2407_v40 = vld [vmem:[#allocation3 + $0x228] ss:$16 sps:$4 sm:$0xff]  }
  0x5d   :  { %1231 = vmatprep.mubr.bf16.mxu1 %v2312_v41  ;;  %1520 = vmatprep.mubr.bf16.mxu0 %v2314_v42  ;;  %v2408_v41 = vld [vmem:[#allocation3 + $0x244] ss:$16 sps:$4 sm:$0xff]   ;;  %v2410_v42 = vld [vmem:[#allocation3 + $0x24c] ss:$16 sps:$4 sm:$0xff]  }
  0x64   :  { %1232 = vmatmul.mubr.bf16.gmra.mrb[8].mxu1 %v2316_v43  ;;  %1521 = vmatmul.mubr.bf16.gmra.mrb[8].mxu0 %v2317_v44  ;;  %v2412_v43 = vld [vmem:[#allocation3 + $0x240] ss:$16 sps:$4 sm:$0xff]   ;;  %v2413_v44 = vld [vmem:[#allocation3 + $0x248] ss:$16 sps:$4 sm:$0xff]  }
  0x65   :  { %1239 = vmatprep.mubr.bf16.mxu1 %v2318_v45  ;;  %1528 = vmatprep.mubr.bf16.mxu0 %v2320_v46  ;;  %v2414_v45 = vld [vmem:[#allocation3 + $0x264] ss:$16 sps:$4 sm:$0xff]   ;;  %v2416_v46 = vld [vmem:[#allocation3 + $0x26c] ss:$16 sps:$4 sm:$0xff]  }
  0x6c   :  { %1240 = vmatmul.mubr.bf16.gmra.mrb[12].mxu1 %v2322_v47  ;;  %1529 = vmatmul.mubr.bf16.gmra.mrb[12].mxu0 %v2323_v48  ;;  %v2418_v47 = vld [vmem:[#allocation3 + $0x260] ss:$16 sps:$4 sm:$0xff]   ;;  %v2419_v48 = vld [vmem:[#allocation3 + $0x268] ss:$16 sps:$4 sm:$0xff]  }
  0x6d   :  { %1247 = vmatprep.mubr.bf16.mxu1 %v2324_v49  ;;  %1536 = vmatprep.mubr.bf16.mxu0 %v2326_v50  ;;  %v2420_v49 = vld [vmem:[#allocation3 + $0x284] ss:$16 sps:$4 sm:$0xff]   ;;  %v2422_v50 = vld [vmem:[#allocation3 + $0x28c] ss:$16 sps:$4 sm:$0xff]  }
  0x74   :  { %1248 = vmatmul.mubr.bf16.gmra.mrb[16].mxu1 %v2328_v51  ;;  %1537 = vmatmul.mubr.bf16.gmra.mrb[16].mxu0 %v2329_v52  ;;  %v2424_v51 = vld [vmem:[#allocation3 + $0x280] ss:$16 sps:$4 sm:$0xff]   ;;  %v2425_v52 = vld [vmem:[#allocation3 + $0x288] ss:$16 sps:$4 sm:$0xff]  }
  0x75   :  { %1255 = vmatprep.mubr.bf16.mxu1 %v2330_v53  ;;  %1544 = vmatprep.mubr.bf16.mxu0 %v2332_v54  ;;  %v2426_v53 = vld [vmem:[#allocation3 + $0x2a4] ss:$16 sps:$4 sm:$0xff]   ;;  %v2428_v54 = vld [vmem:[#allocation3 + $0x2ac] ss:$16 sps:$4 sm:$0xff]  }
  0x7c   :  { %1256 = vmatmul.mubr.bf16.gmra.mrb[20].mxu1 %v2334_v55  ;;  %1545 = vmatmul.mubr.bf16.gmra.mrb[20].mxu0 %v2335_v56  ;;  %v2430_v55 = vld [vmem:[#allocation3 + $0x2a0] ss:$16 sps:$4 sm:$0xff]   ;;  %v2431_v56 = vld [vmem:[#allocation3 + $0x2a8] ss:$16 sps:$4 sm:$0xff]  }
  0x7d   :  { %1263 = vmatprep.mubr.bf16.mxu1 %v2336_v57  ;;  %1552 = vmatprep.mubr.bf16.mxu0 %v2338_v58  ;;  %v2432_v57 = vld [vmem:[#allocation3 + $0x2c4] ss:$16 sps:$4 sm:$0xff]   ;;  %v2434_v58 = vld [vmem:[#allocation3 + $0x2cc] ss:$16 sps:$4 sm:$0xff]  }
  0x84   :  { %1264 = vmatmul.mubr.bf16.gmra.mrb[24].mxu1 %v2340_v59  ;;  %1553 = vmatmul.mubr.bf16.gmra.mrb[24].mxu0 %v2341_v60  ;;  %v2436_v59 = vld [vmem:[#allocation3 + $0x2c0] ss:$16 sps:$4 sm:$0xff]   ;;  %v2437_v60 = vld [vmem:[#allocation3 + $0x2c8] ss:$16 sps:$4 sm:$0xff]  }
  0x85   :  { %1271 = vmatprep.mubr.bf16.mxu1 %v2342_v61  ;;  %1560 = vmatprep.mubr.bf16.mxu0 %v2344_v62  ;;  %v2438_v61 = vld [vmem:[#allocation3 + $0x2e4] ss:$16 sps:$4 sm:$0xff]   ;;  %v2440_v62 = vld [vmem:[#allocation3 + $0x2ec] ss:$16 sps:$4 sm:$0xff]  }
  0x8c   :  { %1272 = vmatmul.mubr.bf16.gmra.mrb[28].mxu1 %v2346_v63  ;;  %1561 = vmatmul.mubr.bf16.gmra.mrb[28].mxu0 %v2347_v0  ;;  %v2442_v63 = vld [vmem:[#allocation3 + $0x2e0] ss:$16 sps:$4 sm:$0xff]   ;;  %v2443_v0 = vld [vmem:[#allocation3 + $0x2e8] ss:$16 sps:$4 sm:$0xff]  }
  0x8d   :  { %1279 = vmatprep.mubr.bf16.mxu1 %v2348_v1  ;;  %1568 = vmatprep.mubr.bf16.mxu0 %v2350_v2  ;;  %v2444_v1 = vld [vmem:[#allocation3 + $0x304] ss:$16 sps:$4 sm:$0xff]   ;;  %v2446_v2 = vld [vmem:[#allocation3 + $0x30c] ss:$16 sps:$4 sm:$0xff]  }
  0x94   :  { %1280 = vmatmul.mubr.bf16.gmra.mrb[32].mxu1 %v2352_v3  ;;  %1569 = vmatmul.mubr.bf16.gmra.mrb[32].mxu0 %v2353_v4  ;;  %v2448_v3 = vld [vmem:[#allocation3 + $0x300] ss:$16 sps:$4 sm:$0xff]   ;;  %v2449_v4 = vld [vmem:[#allocation3 + $0x308] ss:$16 sps:$4 sm:$0xff]  }
  0x95   :  { %1287 = vmatprep.mubr.bf16.mxu1 %v2354_v5  ;;  %1576 = vmatprep.mubr.bf16.mxu0 %v2356_v6  ;;  %v2450_v5 = vld [vmem:[#allocation3 + $0x324] ss:$16 sps:$4 sm:$0xff]   ;;  %v2452_v6 = vld [vmem:[#allocation3 + $0x32c] ss:$16 sps:$4 sm:$0xff]  }
  0x9c   :  { %1288 = vmatmul.mubr.bf16.gmra.mrb[36].mxu1 %v2358_v7  ;;  %1577 = vmatmul.mubr.bf16.gmra.mrb[36].mxu0 %v2359_v8  ;;  %v2454_v7 = vld [vmem:[#allocation3 + $0x320] ss:$16 sps:$4 sm:$0xff]   ;;  %v2455_v8 = vld [vmem:[#allocation3 + $0x328] ss:$16 sps:$4 sm:$0xff]  }
  0x9d   :  { %1295 = vmatprep.mubr.bf16.mxu1 %v2360_v9  ;;  %1584 = vmatprep.mubr.bf16.mxu0 %v2362_v10  ;;  %v2456_v9 = vld [vmem:[#allocation3 + $0x344] ss:$16 sps:$4 sm:$0xff]   ;;  %v2458_v10 = vld [vmem:[#allocation3 + $0x34c] ss:$16 sps:$4 sm:$0xff]  }
  0xa4   :  { %1296 = vmatmul.mubr.bf16.gmra.mrb[40].mxu1 %v2364_v11  ;;  %1585 = vmatmul.mubr.bf16.gmra.mrb[40].mxu0 %v2365_v12  ;;  %v2460_v11 = vld [vmem:[#allocation3 + $0x340] ss:$16 sps:$4 sm:$0xff]   ;;  %v2461_v12 = vld [vmem:[#allocation3 + $0x348] ss:$16 sps:$4 sm:$0xff]  }
  0xa5   :  { %1303 = vmatprep.mubr.bf16.mxu1 %v2366_v13  ;;  %1592 = vmatprep.mubr.bf16.mxu0 %v2368_v14  ;;  %v2462_v13 = vld [vmem:[#allocation3 + $0x364] ss:$16 sps:$4 sm:$0xff]   ;;  %v2464_v14 = vld [vmem:[#allocation3 + $0x36c] ss:$16 sps:$4 sm:$0xff]  }
  0xac   :  { %1304 = vmatmul.mubr.bf16.gmra.mrb[44].mxu1 %v2370_v15  ;;  %1593 = vmatmul.mubr.bf16.gmra.mrb[44].mxu0 %v2371_v16 }
  0xad   :  { %1311 = vmatprep.mubr.bf16.mxu1 %v2372_v17  ;;  %1600 = vmatprep.mubr.bf16.mxu0 %v2374_v18  ;;  %v2466_v18 = vld [vmem:[#allocation3 + $0x360] ss:$16 sps:$4 sm:$0xff]  }
  0xb4   :  { %1312 = vmatmul.mubr.bf16.gmra.mrb[48].mxu1 %v2376_v19  ;;  %1601 = vmatmul.mubr.bf16.gmra.mrb[48].mxu0 %v2377_v20 }
  0xb5   :  { %1319 = vmatprep.mubr.bf16.mxu1 %v2378_v21  ;;  %1608 = vmatprep.mubr.bf16.mxu0 %v2380_v22  ;;  %v2467_v22 = vld [vmem:[#allocation3 + $0x368] ss:$16 sps:$4 sm:$0xff]  }
  0xbc   :  { %1320 = vmatmul.mubr.bf16.gmra.mrb[52].mxu1 %v2382_v23  ;;  %1609 = vmatmul.mubr.bf16.gmra.mrb[52].mxu0 %v2383_v24  ;;  %v2468_v23 = vld [vmem:[#allocation3 + $0x384] ss:$16 sps:$4 sm:$0xff]  }
  0xbd   :  { %1327 = vmatprep.mubr.bf16.mxu1 %v2384_v25  ;;  %1616 = vmatprep.mubr.bf16.mxu0 %v2386_v26  ;;  %v2470_v26 = vld [vmem:[#allocation3 + $0x38c] ss:$16 sps:$4 sm:$0xff]  }
  0xc4   :  { %1328 = vmatmul.mubr.bf16.gmra.mrb[56].mxu1 %v2388_v27  ;;  %1617 = vmatmul.mubr.bf16.gmra.mrb[56].mxu0 %v2389_v28 }
  0xc5   :  { %1335 = vmatprep.mubr.bf16.mxu1 %v2390_v29  ;;  %1624 = vmatprep.mubr.bf16.mxu0 %v2392_v30 }
  0xcc   :  { %1336 = vmatmul.mubr.bf16.gmra.mrb[60].mxu1 %v2394_v31  ;;  %1625 = vmatmul.mubr.bf16.gmra.mrb[60].mxu0 %v2395_v32  ;;  %v2472_v32 = vld [vmem:[#allocation3 + $0x380] ss:$16 sps:$4 sm:$0xff]  }
  0xcd   :  { %1343 = vmatprep.mubr.bf16.mxu1 %v2396_v33  ;;  %1632 = vmatprep.mubr.bf16.mxu0 %v2398_v34 }
  0xd4   :  { %1344 = vmatmul.mubr.bf16.gmra.mrb[64].mxu1 %v2400_v35  ;;  %1633 = vmatmul.mubr.bf16.gmra.mrb[64].mxu0 %v2401_v36  ;;  %v2473_v36 = vld [vmem:[#allocation3 + $0x388] ss:$16 sps:$4 sm:$0xff]  }
  0xd5   :  { %1351 = vmatprep.mubr.bf16.mxu1 %v2402_v37  ;;  %1640 = vmatprep.mubr.bf16.mxu0 %v2404_v38  ;;  %v2474_v37 = vld [vmem:[#allocation3 + $0x3a4] ss:$16 sps:$4 sm:$0xff]  }
  0xdc   :  { %1352 = vmatmul.mubr.bf16.gmra.mrb[68].mxu1 %v2406_v39  ;;  %1641 = vmatmul.mubr.bf16.gmra.mrb[68].mxu0 %v2407_v40  ;;  %v2476_v40 = vld [vmem:[#allocation3 + $0x3ac] ss:$16 sps:$4 sm:$0xff]  }
  0xdd   :  { %1359 = vmatprep.mubr.bf16.mxu1 %v2408_v41  ;;  %1648 = vmatprep.mubr.bf16.mxu0 %v2410_v42 }
  0xe4   :  { %1360 = vmatmul.mubr.bf16.gmra.mrb[72].mxu1 %v2412_v43  ;;  %1649 = vmatmul.mubr.bf16.gmra.mrb[72].mxu0 %v2413_v44 }
  0xe5   :  { %1367 = vmatprep.mubr.bf16.mxu1 %v2414_v45  ;;  %1656 = vmatprep.mubr.bf16.mxu0 %v2416_v46  ;;  %v2478_v46 = vld [vmem:[#allocation3 + $0x3a0] ss:$16 sps:$4 sm:$0xff]  }
  0xec   :  { %1368 = vmatmul.mubr.bf16.gmra.mrb[76].mxu1 %v2418_v47  ;;  %1657 = vmatmul.mubr.bf16.gmra.mrb[76].mxu0 %v2419_v48 }
  0xed   :  { %1375 = vmatprep.mubr.bf16.mxu1 %v2420_v49  ;;  %1664 = vmatprep.mubr.bf16.mxu0 %v2422_v50  ;;  %v2479_v50 = vld [vmem:[#allocation3 + $0x3a8] ss:$16 sps:$4 sm:$0xff]  }
  0xf4   :  { %1376 = vmatmul.mubr.bf16.gmra.mrb[80].mxu1 %v2424_v51  ;;  %1665 = vmatmul.mubr.bf16.gmra.mrb[80].mxu0 %v2425_v52  ;;  %v2480_v51 = vld [vmem:[#allocation3 + $0x3c4] ss:$16 sps:$4 sm:$0xff]  }
  0xf5   :  { %1383 = vmatprep.mubr.bf16.mxu1 %v2426_v53  ;;  %1672 = vmatprep.mubr.bf16.mxu0 %v2428_v54  ;;  %v2482_v54 = vld [vmem:[#allocation3 + $0x3cc] ss:$16 sps:$4 sm:$0xff]  }
  0xfc   :  { %1384 = vmatmul.mubr.bf16.gmra.mrb[84].mxu1 %v2430_v55  ;;  %1673 = vmatmul.mubr.bf16.gmra.mrb[84].mxu0 %v2431_v56 }
  0xfd   :  { %1391 = vmatprep.mubr.bf16.mxu1 %v2432_v57  ;;  %1680 = vmatprep.mubr.bf16.mxu0 %v2434_v58 }
 0x104   :  { %1392 = vmatmul.mubr.bf16.gmra.mrb[88].mxu1 %v2436_v59  ;;  %1681 = vmatmul.mubr.bf16.gmra.mrb[88].mxu0 %v2437_v60  ;;  %v2484_v60 = vld [vmem:[#allocation3 + $0x3c0] ss:$16 sps:$4 sm:$0xff]  }
 0x105   :  { %1399 = vmatprep.mubr.bf16.mxu1 %v2438_v61  ;;  %1688 = vmatprep.mubr.bf16.mxu0 %v2440_v62 }
 0x10c   :  { %1400 = vmatmul.mubr.bf16.gmra.mrb[92].mxu1 %v2442_v63  ;;  %1689 = vmatmul.mubr.bf16.gmra.mrb[92].mxu0 %v2443_v0  ;;  %v2485_v0 = vld [vmem:[#allocation3 + $0x3c8] ss:$16 sps:$4 sm:$0xff]  }
 0x10d   :  { %1407 = vmatprep.mubr.bf16.mxu1 %v2444_v1  ;;  %1696 = vmatprep.mubr.bf16.mxu0 %v2446_v2  ;;  %v2486_v1 = vld [vmem:[#allocation3 + $0x3e4] ss:$16 sps:$4 sm:$0xff]  }
 0x114   :  { %1408 = vmatmul.mubr.bf16.gmra.mrb[96].mxu1 %v2448_v3  ;;  %1697 = vmatmul.mubr.bf16.gmra.mrb[96].mxu0 %v2449_v4  ;;  %v2488_v4 = vld [vmem:[#allocation3 + $0x3ec] ss:$16 sps:$4 sm:$0xff]  }
 0x115   :  { %1415 = vmatprep.mubr.bf16.mxu1 %v2450_v5  ;;  %1704 = vmatprep.mubr.bf16.mxu0 %v2452_v6 }
 0x11c   :  { %1416 = vmatmul.mubr.bf16.gmra.mrb[100].mxu1 %v2454_v7  ;;  %1705 = vmatmul.mubr.bf16.gmra.mrb[100].mxu0 %v2455_v8 }
 0x11d   :  { %1423 = vmatprep.mubr.bf16.mxu1 %v2456_v9  ;;  %1712 = vmatprep.mubr.bf16.mxu0 %v2458_v10  ;;  %v2490_v10 = vld [vmem:[#allocation3 + $0x3e0] ss:$16 sps:$4 sm:$0xff]  }
 0x124   :  { %1424 = vmatmul.mubr.bf16.gmra.mrb[104].mxu1 %v2460_v11  ;;  %1713 = vmatmul.mubr.bf16.gmra.mrb[104].mxu0 %v2461_v12 }
 0x125   :  { %1431 = vmatprep.mubr.bf16.mxu1 %v2462_v13  ;;  %1720 = vmatprep.mubr.bf16.mxu0 %v2464_v14  ;;  %v2491_v14 = vld [vmem:[#allocation3 + $0x3e8] ss:$16 sps:$4 sm:$0xff]  }
 0x127   :  { %v1217_v15 = vpop.f32.mrb[0].mxu1  ;;  %v1506_v16 = vpop.f32.mrb[0].mxu0 }
 0x128   :  { %v1219_v17 = vpop.f32.mrb[1].mxu1  ;;  %v1507_v19 = vadd.f32 %v1506_v16, %v1217_v15  ;;  %v1508_v20 = vpop.f32.mrb[1].mxu0 }
 0x129   :  { %v1220_v21 = vpop.f32.mrb[2].mxu1  ;;  %v1509_v24 = vpop.f32.mrb[2].mxu0 }
 0x12a   :  { %v1222_v25 = vpop.f32.mrb[3].mxu1  ;;  %1956 = vst [vmem:[#allocation6] sm:$0xff] %v1507_v19  ;;  %v1510_v27 = vadd.f32 %v1509_v24, %v1220_v21  ;;  %v1511_v28 = vpop.f32.mrb[3].mxu0 }
 0x12c   :  { %1432 = vmatmul.mubr.bf16.gmra.mrb[108].mxu1 %v2466_v18  ;;  %1957 = vst [vmem:[#allocation6 + $0x8] sm:$0xff] %v1510_v27  ;;  %1721 = vmatmul.mubr.bf16.gmra.mrb[108].mxu0 %v2467_v22 }
 0x12d   :  { %1439 = vmatprep.mubr.bf16.mxu1 %v2468_v23  ;;  %1728 = vmatprep.mubr.bf16.mxu0 %v2470_v26 }
 0x12f   :  { %v1225_v29 = vpop.f32.mrb[4].mxu1  ;;  %v1514_v30 = vpop.f32.mrb[4].mxu0 }
 0x130   :  { %v1227_v31 = vpop.f32.mrb[5].mxu1  ;;  %v1515_v33 = vadd.f32 %v1514_v30, %v1225_v29  ;;  %v1516_v34 = vpop.f32.mrb[5].mxu0 }
 0x131   :  { %v1228_v35 = vpop.f32.mrb[6].mxu1  ;;  %v1517_v38 = vpop.f32.mrb[6].mxu0 }
 0x132   :  { %v1230_v39 = vpop.f32.mrb[7].mxu1  ;;  %1958 = vst [vmem:[#allocation6 + $0x10] sm:$0xff] %v1515_v33  ;;  %v1518_v41 = vadd.f32 %v1517_v38, %v1228_v35  ;;  %v1519_v42 = vpop.f32.mrb[7].mxu0 }
 0x134   :  { %1440 = vmatmul.mubr.bf16.gmra.mrb[112].mxu1 %v2472_v32  ;;  %1959 = vst [vmem:[#allocation6 + $0x18] sm:$0xff] %v1518_v41  ;;  %1729 = vmatmul.mubr.bf16.gmra.mrb[112].mxu0 %v2473_v36 }
 0x135   :  { %1447 = vmatprep.mubr.bf16.mxu1 %v2474_v37  ;;  %1736 = vmatprep.mubr.bf16.mxu0 %v2476_v40 }
 0x137   :  { %v1233_v43 = vpop.f32.mrb[8].mxu1  ;;  %v1522_v44 = vpop.f32.mrb[8].mxu0 }
 0x138   :  { %v1235_v45 = vpop.f32.mrb[9].mxu1  ;;  %v1523_v47 = vadd.f32 %v1522_v44, %v1233_v43  ;;  %v1524_v48 = vpop.f32.mrb[9].mxu0 }
 0x139   :  { %v1236_v49 = vpop.f32.mrb[10].mxu1  ;;  %v1525_v52 = vpop.f32.mrb[10].mxu0 }
 0x13a   :  { %v1238_v53 = vpop.f32.mrb[11].mxu1  ;;  %1960 = vst [vmem:[#allocation6 + $0x20] sm:$0xff] %v1523_v47  ;;  %v1526_v55 = vadd.f32 %v1525_v52, %v1236_v49  ;;  %v1527_v56 = vpop.f32.mrb[11].mxu0 }
 0x13c   :  { %1448 = vmatmul.mubr.bf16.gmra.mrb[116].mxu1 %v2478_v46  ;;  %1961 = vst [vmem:[#allocation6 + $0x28] sm:$0xff] %v1526_v55  ;;  %1737 = vmatmul.mubr.bf16.gmra.mrb[116].mxu0 %v2479_v50 }
 0x13d   :  { %1455 = vmatprep.mubr.bf16.mxu1 %v2480_v51  ;;  %1744 = vmatprep.mubr.bf16.mxu0 %v2482_v54 }
 0x13f   :  { %v1241_v57 = vpop.f32.mrb[12].mxu1  ;;  %v1530_v58 = vpop.f32.mrb[12].mxu0 }
 0x140   :  { %v1243_v59 = vpop.f32.mrb[13].mxu1  ;;  %v1531_v61 = vadd.f32 %v1530_v58, %v1241_v57  ;;  %v1532_v62 = vpop.f32.mrb[13].mxu0 }
 0x141   :  { %v1244_v63 = vpop.f32.mrb[14].mxu1  ;;  %v1533_v2 = vpop.f32.mrb[14].mxu0 }
 0x142   :  { %v1246_v3 = vpop.f32.mrb[15].mxu1  ;;  %1962 = vst [vmem:[#allocation6 + $0x30] sm:$0xff] %v1531_v61  ;;  %v1534_v5 = vadd.f32 %v1533_v2, %v1244_v63  ;;  %v1535_v6 = vpop.f32.mrb[15].mxu0 }
 0x144   :  { %1456 = vmatmul.mubr.bf16.gmra.mrb[120].mxu1 %v2484_v60  ;;  %1963 = vst [vmem:[#allocation6 + $0x38] sm:$0xff] %v1534_v5  ;;  %1745 = vmatmul.mubr.bf16.gmra.mrb[120].mxu0 %v2485_v0 }
 0x145   :  { %1463 = vmatprep.mubr.bf16.mxu1 %v2486_v1  ;;  %1752 = vmatprep.mubr.bf16.mxu0 %v2488_v4 }
 0x147   :  { %v1249_v7 = vpop.f32.mrb[16].mxu1  ;;  %v1538_v8 = vpop.f32.mrb[16].mxu0 }
 0x148   :  { %v1251_v9 = vpop.f32.mrb[17].mxu1  ;;  %v1539_v11 = vadd.f32 %v1538_v8, %v1249_v7  ;;  %v1540_v12 = vpop.f32.mrb[17].mxu0 }
 0x149   :  { %v1252_v13 = vpop.f32.mrb[18].mxu1  ;;  %v1541_v15 = vpop.f32.mrb[18].mxu0 }
 0x14a   :  { %v1254_v16 = vpop.f32.mrb[19].mxu1  ;;  %1964 = vst [vmem:[#allocation6 + $0x40] sm:$0xff] %v1539_v11  ;;  %v1542_v17 = vadd.f32 %v1541_v15, %v1252_v13  ;;  %v1543_v18 = vpop.f32.mrb[19].mxu0 }
 0x14c   :  { %1464 = vmatmul.mubr.bf16.gmra.mrb[124].mxu1 %v2490_v10  ;;  %1965 = vst [vmem:[#allocation6 + $0x48] sm:$0xff] %v1542_v17  ;;  %1753 = vmatmul.mubr.bf16.gmra.mrb[124].mxu0 %v2491_v14 }
 0x14f   :  { %v1257_v19 = vpop.f32.mrb[20].mxu1  ;;  %v1546_v20 = vpop.f32.mrb[20].mxu0 }
 0x150   :  { %v1259_v21 = vpop.f32.mrb[21].mxu1  ;;  %v1547_v22 = vadd.f32 %v1546_v20, %v1257_v19  ;;  %v1548_v23 = vpop.f32.mrb[21].mxu0 }
 0x151   :  { %v1260_v24 = vpop.f32.mrb[22].mxu1  ;;  %v1549_v25 = vpop.f32.mrb[22].mxu0 }
 0x152   :  { %v1262_v26 = vpop.f32.mrb[23].mxu1  ;;  %1966 = vst [vmem:[#allocation6 + $0x50] sm:$0xff] %v1547_v22  ;;  %v1550_v27 = vadd.f32 %v1549_v25, %v1260_v24  ;;  %v1551_v28 = vpop.f32.mrb[23].mxu0 }
 0x154   :  { %1967 = vst [vmem:[#allocation6 + $0x58] sm:$0xff] %v1550_v27 }
 0x157   :  { %v1265_v29 = vpop.f32.mrb[24].mxu1  ;;  %v1554_v30 = vpop.f32.mrb[24].mxu0 }
 0x158   :  { %v1267_v31 = vpop.f32.mrb[25].mxu1  ;;  %v1555_v32 = vadd.f32 %v1554_v30, %v1265_v29  ;;  %v1556_v33 = vpop.f32.mrb[25].mxu0 }
 0x159   :  { %v1268_v34 = vpop.f32.mrb[26].mxu1  ;;  %v1557_v35 = vpop.f32.mrb[26].mxu0 }
 0x15a   :  { %v1270_v36 = vpop.f32.mrb[27].mxu1  ;;  %1968 = vst [vmem:[#allocation6 + $0x60] sm:$0xff] %v1555_v32  ;;  %v1558_v37 = vadd.f32 %v1557_v35, %v1268_v34  ;;  %v1559_v38 = vpop.f32.mrb[27].mxu0 }
 0x15c   :  { %1969 = vst [vmem:[#allocation6 + $0x68] sm:$0xff] %v1558_v37 }
 0x15f   :  { %v1273_v39 = vpop.f32.mrb[28].mxu1  ;;  %v1562_v40 = vpop.f32.mrb[28].mxu0 }
 0x160   :  { %v1275_v41 = vpop.f32.mrb[29].mxu1  ;;  %v1563_v42 = vadd.f32 %v1562_v40, %v1273_v39  ;;  %v1564_v43 = vpop.f32.mrb[29].mxu0 }
 0x161   :  { %v1276_v44 = vpop.f32.mrb[30].mxu1  ;;  %v1565_v45 = vpop.f32.mrb[30].mxu0 }
 0x162   :  { %v1278_v46 = vpop.f32.mrb[31].mxu1  ;;  %1970 = vst [vmem:[#allocation6 + $0x70] sm:$0xff] %v1563_v42  ;;  %v1566_v47 = vadd.f32 %v1565_v45, %v1276_v44  ;;  %v1567_v48 = vpop.f32.mrb[31].mxu0 }
 0x164   :  { %1971 = vst [vmem:[#allocation6 + $0x78] sm:$0xff] %v1566_v47 }
 0x167   :  { %v1281_v49 = vpop.f32.mrb[32].mxu1  ;;  %v1570_v50 = vpop.f32.mrb[32].mxu0 }
 0x168   :  { %v1283_v51 = vpop.f32.mrb[33].mxu1  ;;  %v1571_v52 = vadd.f32 %v1570_v50, %v1281_v49  ;;  %v1572_v53 = vpop.f32.mrb[33].mxu0 }
 0x169   :  { %v1284_v54 = vpop.f32.mrb[34].mxu1  ;;  %v1573_v55 = vpop.f32.mrb[34].mxu0 }
 0x16a   :  { %v1286_v56 = vpop.f32.mrb[35].mxu1  ;;  %1972 = vst [vmem:[#allocation6 + $0x80] sm:$0xff] %v1571_v52  ;;  %v1574_v57 = vadd.f32 %v1573_v55, %v1284_v54  ;;  %v1575_v58 = vpop.f32.mrb[35].mxu0 }
 0x16c   :  { %1973 = vst [vmem:[#allocation6 + $0x88] sm:$0xff] %v1574_v57 }
 0x16f   :  { %v1289_v59 = vpop.f32.mrb[36].mxu1  ;;  %v1578_v60 = vpop.f32.mrb[36].mxu0 }
 0x170   :  { %v1291_v61 = vpop.f32.mrb[37].mxu1  ;;  %v1579_v62 = vadd.f32 %v1578_v60, %v1289_v59  ;;  %v1580_v63 = vpop.f32.mrb[37].mxu0 }
 0x171   :  { %v1292_v0 = vpop.f32.mrb[38].mxu1  ;;  %v1581_v1 = vpop.f32.mrb[38].mxu0 }
 0x172   :  { %v1294_v2 = vpop.f32.mrb[39].mxu1  ;;  %1974 = vst [vmem:[#allocation6 + $0x90] sm:$0xff] %v1579_v62  ;;  %v1582_v3 = vadd.f32 %v1581_v1, %v1292_v0  ;;  %v1583_v4 = vpop.f32.mrb[39].mxu0 }
 0x174   :  { %1975 = vst [vmem:[#allocation6 + $0x98] sm:$0xff] %v1582_v3 }
 0x177   :  { %v1297_v5 = vpop.f32.mrb[40].mxu1  ;;  %v1586_v6 = vpop.f32.mrb[40].mxu0 }
 0x178   :  { %v1299_v7 = vpop.f32.mrb[41].mxu1  ;;  %v1587_v8 = vadd.f32 %v1586_v6, %v1297_v5  ;;  %v1588_v9 = vpop.f32.mrb[41].mxu0 }
 0x179   :  { %v1300_v10 = vpop.f32.mrb[42].mxu1  ;;  %v1589_v11 = vpop.f32.mrb[42].mxu0 }
 0x17a   :  { %v1302_v12 = vpop.f32.mrb[43].mxu1  ;;  %1976 = vst [vmem:[#allocation6 + $0xa0] sm:$0xff] %v1587_v8  ;;  %v1590_v13 = vadd.f32 %v1589_v11, %v1300_v10  ;;  %v1591_v14 = vpop.f32.mrb[43].mxu0 }
 0x17c   :  { %1977 = vst [vmem:[#allocation6 + $0xa8] sm:$0xff] %v1590_v13 }
 0x17f   :  { %v1305_v15 = vpop.f32.mrb[44].mxu1  ;;  %v1594_v16 = vpop.f32.mrb[44].mxu0 }
 0x180   :  { %v1307_v17 = vpop.f32.mrb[45].mxu1  ;;  %v1595_v18 = vadd.f32 %v1594_v16, %v1305_v15  ;;  %v1596_v19 = vpop.f32.mrb[45].mxu0 }
 0x181   :  { %v1308_v20 = vpop.f32.mrb[46].mxu1  ;;  %v1597_v21 = vpop.f32.mrb[46].mxu0 }
 0x182   :  { %v1310_v22 = vpop.f32.mrb[47].mxu1  ;;  %1978 = vst [vmem:[#allocation6 + $0xb0] sm:$0xff] %v1595_v18  ;;  %v1598_v23 = vadd.f32 %v1597_v21, %v1308_v20  ;;  %v1599_v24 = vpop.f32.mrb[47].mxu0 }
 0x184   :  { %1979 = vst [vmem:[#allocation6 + $0xb8] sm:$0xff] %v1598_v23 }
 0x187   :  { %v1313_v25 = vpop.f32.mrb[48].mxu1  ;;  %v1602_v26 = vpop.f32.mrb[48].mxu0 }
 0x188   :  { %v1315_v27 = vpop.f32.mrb[49].mxu1  ;;  %v1603_v28 = vadd.f32 %v1602_v26, %v1313_v25  ;;  %v1604_v29 = vpop.f32.mrb[49].mxu0 }
 0x189   :  { %v1316_v30 = vpop.f32.mrb[50].mxu1  ;;  %v1605_v31 = vpop.f32.mrb[50].mxu0 }
 0x18a   :  { %v1318_v32 = vpop.f32.mrb[51].mxu1  ;;  %1980 = vst [vmem:[#allocation6 + $0xc0] sm:$0xff] %v1603_v28  ;;  %v1606_v33 = vadd.f32 %v1605_v31, %v1316_v30  ;;  %v1607_v34 = vpop.f32.mrb[51].mxu0 }
 0x18c   :  { %1981 = vst [vmem:[#allocation6 + $0xc8] sm:$0xff] %v1606_v33 }
 0x18f   :  { %v1321_v35 = vpop.f32.mrb[52].mxu1  ;;  %v1610_v36 = vpop.f32.mrb[52].mxu0 }
 0x190   :  { %v1323_v37 = vpop.f32.mrb[53].mxu1  ;;  %v1611_v38 = vadd.f32 %v1610_v36, %v1321_v35  ;;  %v1612_v39 = vpop.f32.mrb[53].mxu0 }
 0x191   :  { %v1324_v40 = vpop.f32.mrb[54].mxu1  ;;  %v1613_v41 = vpop.f32.mrb[54].mxu0 }
 0x192   :  { %v1326_v42 = vpop.f32.mrb[55].mxu1  ;;  %1982 = vst [vmem:[#allocation6 + $0xd0] sm:$0xff] %v1611_v38  ;;  %v1614_v43 = vadd.f32 %v1613_v41, %v1324_v40  ;;  %v1615_v44 = vpop.f32.mrb[55].mxu0 }
 0x194   :  { %1983 = vst [vmem:[#allocation6 + $0xd8] sm:$0xff] %v1614_v43 }
 0x197   :  { %v1329_v45 = vpop.f32.mrb[56].mxu1  ;;  %v1618_v46 = vpop.f32.mrb[56].mxu0 }
 0x198   :  { %v1331_v47 = vpop.f32.mrb[57].mxu1  ;;  %v1619_v48 = vadd.f32 %v1618_v46, %v1329_v45  ;;  %v1620_v49 = vpop.f32.mrb[57].mxu0 }
 0x199   :  { %v1332_v50 = vpop.f32.mrb[58].mxu1  ;;  %v1621_v51 = vpop.f32.mrb[58].mxu0 }
 0x19a   :  { %v1334_v52 = vpop.f32.mrb[59].mxu1  ;;  %1984 = vst [vmem:[#allocation6 + $0xe0] sm:$0xff] %v1619_v48  ;;  %v1622_v53 = vadd.f32 %v1621_v51, %v1332_v50  ;;  %v1623_v54 = vpop.f32.mrb[59].mxu0 }
 0x19c   :  { %1985 = vst [vmem:[#allocation6 + $0xe8] sm:$0xff] %v1622_v53 }
 0x19f   :  { %v1337_v55 = vpop.f32.mrb[60].mxu1  ;;  %v1626_v56 = vpop.f32.mrb[60].mxu0 }
 0x1a0   :  { %v1339_v57 = vpop.f32.mrb[61].mxu1  ;;  %v1627_v58 = vadd.f32 %v1626_v56, %v1337_v55  ;;  %v1628_v59 = vpop.f32.mrb[61].mxu0 }
 0x1a1   :  { %v1340_v60 = vpop.f32.mrb[62].mxu1  ;;  %v1629_v61 = vpop.f32.mrb[62].mxu0 }
 0x1a2   :  { %v1342_v62 = vpop.f32.mrb[63].mxu1  ;;  %1986 = vst [vmem:[#allocation6 + $0xf0] sm:$0xff] %v1627_v58  ;;  %v1630_v63 = vadd.f32 %v1629_v61, %v1340_v60  ;;  %v1631_v0 = vpop.f32.mrb[63].mxu0 }
 0x1a4   :  { %1987 = vst [vmem:[#allocation6 + $0xf8] sm:$0xff] %v1630_v63 }
 0x1a7   :  { %v1345_v1 = vpop.f32.mrb[64].mxu1  ;;  %v1634_v2 = vpop.f32.mrb[64].mxu0 }
 0x1a8   :  { %v1347_v3 = vpop.f32.mrb[65].mxu1  ;;  %v1635_v4 = vadd.f32 %v1634_v2, %v1345_v1  ;;  %v1636_v5 = vpop.f32.mrb[65].mxu0 }
 0x1a9   :  { %v1348_v6 = vpop.f32.mrb[66].mxu1  ;;  %v1637_v7 = vpop.f32.mrb[66].mxu0 }
 0x1aa   :  { %v1350_v8 = vpop.f32.mrb[67].mxu1  ;;  %1988 = vst [vmem:[#allocation6 + $0x100] sm:$0xff] %v1635_v4  ;;  %v1638_v9 = vadd.f32 %v1637_v7, %v1348_v6  ;;  %v1639_v10 = vpop.f32.mrb[67].mxu0 }
 0x1ac   :  { %1989 = vst [vmem:[#allocation6 + $0x108] sm:$0xff] %v1638_v9 }
 0x1af   :  { %v1353_v11 = vpop.f32.mrb[68].mxu1  ;;  %v1642_v12 = vpop.f32.mrb[68].mxu0 }
 0x1b0   :  { %v1355_v13 = vpop.f32.mrb[69].mxu1  ;;  %v1643_v14 = vadd.f32 %v1642_v12, %v1353_v11  ;;  %v1644_v15 = vpop.f32.mrb[69].mxu0 }
 0x1b1   :  { %v1356_v16 = vpop.f32.mrb[70].mxu1  ;;  %v1645_v17 = vpop.f32.mrb[70].mxu0 }
 0x1b2   :  { %v1358_v18 = vpop.f32.mrb[71].mxu1  ;;  %1990 = vst [vmem:[#allocation6 + $0x110] sm:$0xff] %v1643_v14  ;;  %v1646_v19 = vadd.f32 %v1645_v17, %v1356_v16  ;;  %v1647_v20 = vpop.f32.mrb[71].mxu0 }
 0x1b4   :  { %1991 = vst [vmem:[#allocation6 + $0x118] sm:$0xff] %v1646_v19 }
 0x1b7   :  { %v1361_v21 = vpop.f32.mrb[72].mxu1  ;;  %v1650_v22 = vpop.f32.mrb[72].mxu0 }
 0x1b8   :  { %v1363_v23 = vpop.f32.mrb[73].mxu1  ;;  %v1651_v24 = vadd.f32 %v1650_v22, %v1361_v21  ;;  %v1652_v25 = vpop.f32.mrb[73].mxu0 }
 0x1b9   :  { %v1364_v26 = vpop.f32.mrb[74].mxu1  ;;  %v1653_v27 = vpop.f32.mrb[74].mxu0 }
 0x1ba   :  { %v1366_v28 = vpop.f32.mrb[75].mxu1  ;;  %1992 = vst [vmem:[#allocation6 + $0x120] sm:$0xff] %v1651_v24  ;;  %v1654_v29 = vadd.f32 %v1653_v27, %v1364_v26  ;;  %v1655_v30 = vpop.f32.mrb[75].mxu0 }
 0x1bc   :  { %1993 = vst [vmem:[#allocation6 + $0x128] sm:$0xff] %v1654_v29 }
 0x1bf   :  { %v1369_v31 = vpop.f32.mrb[76].mxu1  ;;  %v1658_v32 = vpop.f32.mrb[76].mxu0 }
 0x1c0   :  { %v1371_v33 = vpop.f32.mrb[77].mxu1  ;;  %v1659_v34 = vadd.f32 %v1658_v32, %v1369_v31  ;;  %v1660_v35 = vpop.f32.mrb[77].mxu0 }
 0x1c1   :  { %v1372_v36 = vpop.f32.mrb[78].mxu1  ;;  %v1661_v37 = vpop.f32.mrb[78].mxu0 }
 0x1c2   :  { %v1374_v38 = vpop.f32.mrb[79].mxu1  ;;  %1994 = vst [vmem:[#allocation6 + $0x130] sm:$0xff] %v1659_v34  ;;  %v1662_v39 = vadd.f32 %v1661_v37, %v1372_v36  ;;  %v1663_v40 = vpop.f32.mrb[79].mxu0 }
 0x1c4   :  { %1995 = vst [vmem:[#allocation6 + $0x138] sm:$0xff] %v1662_v39 }
 0x1c7   :  { %v1377_v41 = vpop.f32.mrb[80].mxu1  ;;  %v1666_v42 = vpop.f32.mrb[80].mxu0 }
 0x1c8   :  { %v1379_v43 = vpop.f32.mrb[81].mxu1  ;;  %v1667_v44 = vadd.f32 %v1666_v42, %v1377_v41  ;;  %v1668_v45 = vpop.f32.mrb[81].mxu0 }
 0x1c9   :  { %v1380_v46 = vpop.f32.mrb[82].mxu1  ;;  %v1669_v47 = vpop.f32.mrb[82].mxu0 }
 0x1ca   :  { %v1382_v48 = vpop.f32.mrb[83].mxu1  ;;  %1996 = vst [vmem:[#allocation6 + $0x140] sm:$0xff] %v1667_v44  ;;  %v1670_v49 = vadd.f32 %v1669_v47, %v1380_v46  ;;  %v1671_v50 = vpop.f32.mrb[83].mxu0 }
 0x1cc   :  { %1997 = vst [vmem:[#allocation6 + $0x148] sm:$0xff] %v1670_v49 }
 0x1cf   :  { %v1385_v51 = vpop.f32.mrb[84].mxu1  ;;  %v1674_v52 = vpop.f32.mrb[84].mxu0 }
 0x1d0   :  { %v1387_v53 = vpop.f32.mrb[85].mxu1  ;;  %v1675_v54 = vadd.f32 %v1674_v52, %v1385_v51  ;;  %v1676_v55 = vpop.f32.mrb[85].mxu0 }
 0x1d1   :  { %v1388_v56 = vpop.f32.mrb[86].mxu1  ;;  %v1677_v57 = vpop.f32.mrb[86].mxu0 }
 0x1d2   :  { %v1390_v58 = vpop.f32.mrb[87].mxu1  ;;  %1998 = vst [vmem:[#allocation6 + $0x150] sm:$0xff] %v1675_v54  ;;  %v1678_v59 = vadd.f32 %v1677_v57, %v1388_v56  ;;  %v1679_v60 = vpop.f32.mrb[87].mxu0 }
 0x1d4   :  { %1999 = vst [vmem:[#allocation6 + $0x158] sm:$0xff] %v1678_v59 }
 0x1d7   :  { %v1393_v61 = vpop.f32.mrb[88].mxu1  ;;  %v1682_v62 = vpop.f32.mrb[88].mxu0 }
 0x1d8   :  { %v1395_v63 = vpop.f32.mrb[89].mxu1  ;;  %v1683_v0 = vadd.f32 %v1682_v62, %v1393_v61  ;;  %v1684_v1 = vpop.f32.mrb[89].mxu0 }
 0x1d9   :  { %v1396_v2 = vpop.f32.mrb[90].mxu1  ;;  %v1685_v3 = vpop.f32.mrb[90].mxu0 }
 0x1da   :  { %v1398_v4 = vpop.f32.mrb[91].mxu1  ;;  %2000 = vst [vmem:[#allocation6 + $0x160] sm:$0xff] %v1683_v0  ;;  %v1686_v5 = vadd.f32 %v1685_v3, %v1396_v2  ;;  %v1687_v6 = vpop.f32.mrb[91].mxu0 }
 0x1dc   :  { %2001 = vst [vmem:[#allocation6 + $0x168] sm:$0xff] %v1686_v5 }
 0x1df   :  { %v1401_v7 = vpop.f32.mrb[92].mxu1  ;;  %v1690_v8 = vpop.f32.mrb[92].mxu0 }
 0x1e0   :  { %v1403_v9 = vpop.f32.mrb[93].mxu1  ;;  %v1691_v10 = vadd.f32 %v1690_v8, %v1401_v7  ;;  %v1692_v11 = vpop.f32.mrb[93].mxu0 }
 0x1e1   :  { %v1404_v12 = vpop.f32.mrb[94].mxu1  ;;  %v1693_v13 = vpop.f32.mrb[94].mxu0 }
 0x1e2   :  { %v1406_v14 = vpop.f32.mrb[95].mxu1  ;;  %2002 = vst [vmem:[#allocation6 + $0x170] sm:$0xff] %v1691_v10  ;;  %v1694_v15 = vadd.f32 %v1693_v13, %v1404_v12  ;;  %v1695_v16 = vpop.f32.mrb[95].mxu0 }
 0x1e4   :  { %2003 = vst [vmem:[#allocation6 + $0x178] sm:$0xff] %v1694_v15 }
 0x1e7   :  { %v1409_v17 = vpop.f32.mrb[96].mxu1  ;;  %v1698_v18 = vpop.f32.mrb[96].mxu0 }
 0x1e8   :  { %v1411_v19 = vpop.f32.mrb[97].mxu1  ;;  %v1699_v20 = vadd.f32 %v1698_v18, %v1409_v17  ;;  %v1700_v21 = vpop.f32.mrb[97].mxu0 }
 0x1e9   :  { %v1412_v22 = vpop.f32.mrb[98].mxu1  ;;  %v1701_v23 = vpop.f32.mrb[98].mxu0 }
 0x1ea   :  { %v1414_v24 = vpop.f32.mrb[99].mxu1  ;;  %2004 = vst [vmem:[#allocation6 + $0x180] sm:$0xff] %v1699_v20  ;;  %v1702_v25 = vadd.f32 %v1701_v23, %v1412_v22  ;;  %v1703_v26 = vpop.f32.mrb[99].mxu0 }
 0x1ec   :  { %2005 = vst [vmem:[#allocation6 + $0x188] sm:$0xff] %v1702_v25 }
 0x1ef   :  { %v1417_v27 = vpop.f32.mrb[100].mxu1  ;;  %v1706_v28 = vpop.f32.mrb[100].mxu0 }
 0x1f0   :  { %v1419_v29 = vpop.f32.mrb[101].mxu1  ;;  %v1707_v30 = vadd.f32 %v1706_v28, %v1417_v27  ;;  %v1708_v31 = vpop.f32.mrb[101].mxu0 }
 0x1f1   :  { %v1420_v32 = vpop.f32.mrb[102].mxu1  ;;  %v1709_v33 = vpop.f32.mrb[102].mxu0 }
 0x1f2   :  { %v1422_v34 = vpop.f32.mrb[103].mxu1  ;;  %2006 = vst [vmem:[#allocation6 + $0x190] sm:$0xff] %v1707_v30  ;;  %v1710_v35 = vadd.f32 %v1709_v33, %v1420_v32  ;;  %v1711_v36 = vpop.f32.mrb[103].mxu0 }
 0x1f4   :  { %2007 = vst [vmem:[#allocation6 + $0x198] sm:$0xff] %v1710_v35 }
 0x1f7   :  { %v1425_v37 = vpop.f32.mrb[104].mxu1  ;;  %v1714_v38 = vpop.f32.mrb[104].mxu0 }
 0x1f8   :  { %v1427_v39 = vpop.f32.mrb[105].mxu1  ;;  %v1715_v40 = vadd.f32 %v1714_v38, %v1425_v37  ;;  %v1716_v41 = vpop.f32.mrb[105].mxu0 }
 0x1f9   :  { %v1428_v42 = vpop.f32.mrb[106].mxu1  ;;  %v1717_v43 = vpop.f32.mrb[106].mxu0 }
 0x1fa   :  { %v1430_v44 = vpop.f32.mrb[107].mxu1  ;;  %2008 = vst [vmem:[#allocation6 + $0x1a0] sm:$0xff] %v1715_v40  ;;  %v1718_v45 = vadd.f32 %v1717_v43, %v1428_v42  ;;  %v1719_v46 = vpop.f32.mrb[107].mxu0 }
 0x1fc   :  { %2009 = vst [vmem:[#allocation6 + $0x1a8] sm:$0xff] %v1718_v45 }
 0x1ff   :  { %v1433_v47 = vpop.f32.mrb[108].mxu1  ;;  %v1722_v48 = vpop.f32.mrb[108].mxu0 }
 0x200   :  { %v1435_v49 = vpop.f32.mrb[109].mxu1  ;;  %v1723_v50 = vadd.f32 %v1722_v48, %v1433_v47  ;;  %v1724_v51 = vpop.f32.mrb[109].mxu0 }
 0x201   :  { %v1436_v52 = vpop.f32.mrb[110].mxu1  ;;  %v1725_v53 = vpop.f32.mrb[110].mxu0 }
 0x202   :  { %v1438_v54 = vpop.f32.mrb[111].mxu1  ;;  %2010 = vst [vmem:[#allocation6 + $0x1b0] sm:$0xff] %v1723_v50  ;;  %v1726_v55 = vadd.f32 %v1725_v53, %v1436_v52  ;;  %v1727_v56 = vpop.f32.mrb[111].mxu0 }
 0x204   :  { %2011 = vst [vmem:[#allocation6 + $0x1b8] sm:$0xff] %v1726_v55 }
 0x207   :  { %v1441_v57 = vpop.f32.mrb[112].mxu1  ;;  %v1730_v58 = vpop.f32.mrb[112].mxu0 }
 0x208   :  { %v1443_v59 = vpop.f32.mrb[113].mxu1  ;;  %v1731_v60 = vadd.f32 %v1730_v58, %v1441_v57  ;;  %v1732_v61 = vpop.f32.mrb[113].mxu0 }
 0x209   :  { %v1444_v62 = vpop.f32.mrb[114].mxu1  ;;  %v1733_v63 = vpop.f32.mrb[114].mxu0 }
 0x20a   :  { %v1446_v0 = vpop.f32.mrb[115].mxu1  ;;  %2012 = vst [vmem:[#allocation6 + $0x1c0] sm:$0xff] %v1731_v60  ;;  %v1734_v1 = vadd.f32 %v1733_v63, %v1444_v62  ;;  %v1735_v2 = vpop.f32.mrb[115].mxu0 }
 0x20c   :  { %2013 = vst [vmem:[#allocation6 + $0x1c8] sm:$0xff] %v1734_v1 }
 0x20f   :  { %v1449_v3 = vpop.f32.mrb[116].mxu1  ;;  %v1738_v4 = vpop.f32.mrb[116].mxu0 }
 0x210   :  { %v1451_v5 = vpop.f32.mrb[117].mxu1  ;;  %v1739_v6 = vadd.f32 %v1738_v4, %v1449_v3  ;;  %v1740_v7 = vpop.f32.mrb[117].mxu0 }
 0x211   :  { %v1452_v8 = vpop.f32.mrb[118].mxu1  ;;  %v1741_v9 = vpop.f32.mrb[118].mxu0 }
 0x212   :  { %v1454_v10 = vpop.f32.mrb[119].mxu1  ;;  %2014 = vst [vmem:[#allocation6 + $0x1d0] sm:$0xff] %v1739_v6  ;;  %v1742_v11 = vadd.f32 %v1741_v9, %v1452_v8  ;;  %v1743_v12 = vpop.f32.mrb[119].mxu0 }
 0x214   :  { %2015 = vst [vmem:[#allocation6 + $0x1d8] sm:$0xff] %v1742_v11 }
 0x217   :  { %v1457_v13 = vpop.f32.mrb[120].mxu1  ;;  %v1746_v14 = vpop.f32.mrb[120].mxu0 }
 0x218   :  { %v1459_v15 = vpop.f32.mrb[121].mxu1  ;;  %v1747_v16 = vadd.f32 %v1746_v14, %v1457_v13  ;;  %v1748_v17 = vpop.f32.mrb[121].mxu0 }
 0x219   :  { %v1460_v18 = vpop.f32.mrb[122].mxu1  ;;  %v1749_v19 = vpop.f32.mrb[122].mxu0 }
 0x21a   :  { %v1462_v20 = vpop.f32.mrb[123].mxu1  ;;  %2016 = vst [vmem:[#allocation6 + $0x1e0] sm:$0xff] %v1747_v16  ;;  %v1750_v21 = vadd.f32 %v1749_v19, %v1460_v18  ;;  %v1751_v22 = vpop.f32.mrb[123].mxu0 }
 0x21c   :  { %2017 = vst [vmem:[#allocation6 + $0x1e8] sm:$0xff] %v1750_v21 }
 0x21f   :  { %v1465_v23 = vpop.f32.mrb[124].mxu1  ;;  %v1754_v24 = vpop.f32.mrb[124].mxu0 }
 0x220   :  { %v1467_v25 = vpop.f32.mrb[125].mxu1  ;;  %v1755_v26 = vadd.f32 %v1754_v24, %v1465_v23  ;;  %v1756_v27 = vpop.f32.mrb[125].mxu0 }
 0x221   :  { %v1468_v28 = vpop.f32.mrb[126].mxu1  ;;  %v1757_v29 = vpop.f32.mrb[126].mxu0 }
 0x222   :  { %v1470_v30 = vpop.f32.mrb[127].mxu1  ;;  %2018 = vst [vmem:[#allocation6 + $0x1f0] sm:$0xff] %v1755_v26  ;;  %v1758_v31 = vadd.f32 %v1757_v29, %v1468_v28  ;;  %v1759_v32 = vpop.f32.mrb[127].mxu0 }
 0x224   :  { %2019 = vst [vmem:[#allocation6 + $0x1f8] sm:$0xff] %v1758_v31 }
 0x225   :  { %2525 = shalt.err (!%p2522_p12)
}
 0x226   :  { %s2526_s4 = scalar_lea.hbm %s2716_s2, 8192 }
 0x227   :  { %p2527_p13 = scmp.ne.s32.totalorder %s2716_s2, %s2526_s4  ;;  %p2530_p0 = scmp.lt.u32.totalorder %s2526_s4, %s2716_s2 }
 0x229   :  { %p2532_p1 = pnand %p2530_p0, %p2527_p13 }
 0x22b   :  { %2535 = shalt.err (!%p2532_p1)
}
 0x22c   :  { %s2545_s9 = smov 128   ;;  %s2546_s10 = smov 8  }
 0x22d   :  { %2031 = dma.vmem_to_hbm [thread:$0]  %s2026_s0, 8192, %s2716_s2, [#allocation5], %s2545_s9, %s2545_s9, %s2546_s10  }
 0x22e   :  { %2538 = dma.done.wait [#allocation5], 8192  }
 0x22f   :  { %2539 = vsyncadd [#allocation5], 4294959104 }
 0x230   :  { %2035 = vsyncpa [#allocation4], 1 }
 0x231   :  { %2036 = vsyncpa [#allocation5], 1 }

</bundles_post_ra>
